<compile_context>
chip_gen: v6e
topology: v6e:2x2x1
jax: 0.10.0
libtpu: 0.0.40
codegen_flags: <defaults>
</compile_context>

<pallas_src>
import jax
import jax.numpy as jnp
from jax import lax
from jax.experimental import pallas as pl
from jax.experimental.pallas import tpu as pltpu


def _choose_fold(batch, labels, lane_target=512):
    """Largest zero-copy fold factor k (k | batch); prefer k*labels % 128 == 0."""
    if labels >= lane_target:
        return 1
    k_max = max(1, lane_target // labels)
    best = 1
    for k in range(k_max, 0, -1):
        if batch % k == 0:
            if (k * labels) % 128 == 0:
                return k          # full-lane fold that also divides the batch
            if best == 1:
                best = k          # largest zero-copy fold as fallback
    return best


def dice_loss(logits, targets, epsilon=1e-08, *,
              core_split=1, lane_target=512, step_bytes=4 * 1024 * 1024):
    """Pallas TPU implementation of DiceLoss.forward.

    logits, targets: (batch, num_labels) arrays. Returns a scalar float32.
    bf16 / int8 inputs are welcome (halve HBM traffic); upcast happens in-kernel.
    On v7x, consider step_bytes=8-16 MiB (and a larger vmem_limit) per TC.
    """
    assert logits.shape == targets.shape and logits.ndim == 2
    B, L = logits.shape

    # --- Zero-copy lane fold: (B, L) -> (B2, kL) with k | B (row-major, free).
    k = _choose_fold(B, L, lane_target)
    kL = k * L
    B2 = B // k
    logits2 = logits.reshape(B2, kL)
    targets2 = targets.reshape(B2, kL)

    it_l = jnp.dtype(logits.dtype).itemsize
    it_t = jnp.dtype(targets.dtype).itemsize
    sub = max(32 // min(it_l, it_t), 8)     # sublane multiple: f32:8 bf16:16 int8:32

    NC = core_split if B2 >= 2 * sub * core_split else 1

    # --- Tile rows so one grid step streams ~step_bytes of input (both operands).
    bytes_per_row = kL * (it_l + it_t)
    rows_target = max(sub, (step_bytes // max(1, bytes_per_row)) // sub * sub)
    tb_cap = (B2 // sub) * sub              # largest aligned tile not exceeding B2
    if tb_cap == 0:
        NC, TB = 1, B2                      # tiny input: single full-extent block
    else:
        TB = min(rows_target, tb_cap)
    R = 8 if TB % 8 == 0 else 1             # sublane-partial rows kept per quantity
    T = pl.cdiv(B2, NC * TB)                # batch tiles per core

    def kernel(nrows_ref, logits_ref, targets_ref, out_ref):
        c = pl.program_id(0)
        t = pl.program_id(1)

        @pl.when(t == 0)
        def _():
            out_ref[...] = jnp.zeros_like(out_ref)

        # Row mask for the (possibly partial) last tile: select to zero BEFORE
        # multiply/reduce so undefined OOB contents cannot propagate (NaN-safe).
        row0 = (c * T + t) * TB
        rows = lax.broadcasted_iota(jnp.int32, (TB, 1), 0) + row0
        valid = rows < nrows_ref[0]

        probs = jnp.where(valid,
                          jax.nn.sigmoid(logits_ref[...].astype(jnp.float32)),
                          0.0)
        tgt = jnp.where(valid, targets_ref[...].astype(jnp.float32), 0.0)

        pt = probs * tgt        # per-element intersection
        su = probs + tgt        # single combined term for the union reduce
        if R == 8:
            # Cross-vreg VPU adds only; the cross-sublane (XLU) reduce is
            # deferred to the tiny JAX epilogue.
            inter = pt.reshape(TB // 8, 8, kL).sum(axis=0)
            union = su.reshape(TB // 8, 8, kL).sum(axis=0)
        else:
            inter = pt.sum(axis=0, keepdims=True)
            union = su.sum(axis=0, keepdims=True)
        out_ref[0, 0:R, :] += inter
        out_ref[0, R:2 * R, :] += union

    cost = pl.CostEstimate(
        flops=6 * B2 * kL,
        transcendentals=B2 * kL,
        bytes_accessed=B2 * kL * (it_l + it_t) + NC * 2 * R * kL * 4,
    )

    grid_spec = pltpu.PrefetchScalarGridSpec(
        num_scalar_prefetch=1,
        grid=(NC, T),
        in_specs=[
            pl.BlockSpec((TB, kL), lambda c, t, n: (c * T + t, 0)),
            pl.BlockSpec((TB, kL), lambda c, t, n: (c * T + t, 0)),
        ],
        out_specs=pl.BlockSpec((1, 2 * R, kL), lambda c, t, n: (c, 0, 0)),
    )

    partials = pl.pallas_call(
        kernel,
        out_shape=jax.ShapeDtypeStruct((NC, 2 * R, kL), jnp.float32),
        grid_spec=grid_spec,
        compiler_params=pltpu.CompilerParams(
            dimension_semantics=("parallel", "arbitrary"),
            vmem_limit_bytes=32 * 1024 * 1024,
        ),
        cost_estimate=cost,
    )(jnp.array([B2], dtype=jnp.int32), logits2, targets2)

    # Tiny epilogue in plain JAX: fold (core, sublane-partial, k) back to (2, L).
    sums = partials.reshape(NC, 2, R, k, L).sum(axis=(0, 2, 3))   # (2, L)
    intersection, union = sums[0], sums[1]
    dice_score = (2.0 * intersection + epsilon) / (union + epsilon)
    return jnp.mean(1.0 - dice_score)


def _reference_dice_loss(logits, targets, epsilon=1e-08):
    # Pure-JAX reference mirroring the PyTorch per-label loop.
    probs = jax.nn.sigmoid(logits.astype(jnp.float32))
    t = targets.astype(jnp.float32)
    num_labels = probs.shape[1]
    loss = 0.0
    for i in range(num_labels):
        p = probs[:, i]
        ti = t[:, i]
        intersection = jnp.sum(p * ti)
        union = jnp.sum(p) + jnp.sum(ti)
        dice_score = (2.0 * intersection + epsilon) / (union + epsilon)
        loss = loss + (1.0 - dice_score)
    return loss / num_labels


if __name__ == "__main__":
    key = jax.random.PRNGKey(0)
    dice_fn = jax.jit(dice_loss)

    # Case 1: tiny shape (single full-extent block path).
    k1, k2, k3, k4 = jax.random.split(key, 4)
    logits_a = jax.random.normal(k1, (100, 8), dtype=jnp.float32)
    targets_a = (jax.random.uniform(k2, (100, 8)) > 0.5).astype(jnp.float32)
    out_a = jax.block_until_ready(dice_fn(logits_a, targets_a))
    ref_a = jax.block_until_ready(_reference_dice_loss(logits_a, targets_a))
    assert jnp.allclose(out_a, ref_a, atol=1e-5, rtol=1e-5), (out_a, ref_a)

    # Case 2: exercises the tiled grid + masked partial last tile path.
    logits_b = jax.random.normal(k3, (1000, 8), dtype=jnp.float32)
    targets_b = (jax.random.uniform(k4, (1000, 8)) > 0.5).astype(jnp.float32)
    out_b = jax.block_until_ready(dice_fn(logits_b, targets_b))
    ref_b = jax.block_until_ready(_reference_dice_loss(logits_b, targets_b))
    assert jnp.allclose(out_b, ref_b, atol=1e-5, rtol=1e-5), (out_b, ref_b)

    print("KERNEL_OK")
</pallas_src>

<mosaic_0001>
module attributes {stable_mosaic.version = 11 : i64} {
  func.func @kernel(%arg0: i32, %arg1: i32, %arg2: memref<1xi32, #tpu.memory_space<smem>>, %arg3: memref<2x400xf32, #tpu.memory_space<vmem>>, %arg4: memref<2x400xf32, #tpu.memory_space<vmem>>, %arg5: memref<1x2x400xf32, #tpu.memory_space<vmem>>) attributes {dimension_semantics = [#tpu.dimension_semantics<parallel>, #tpu.dimension_semantics<arbitrary>], iteration_bounds = array<i64: 1, 1>, scalar_prefetch = 1 : i64, scratch_operands = 0 : i64, tpu.core_type = #tpu.core_type<tc>, window_params = [{transform_indices = @transform_0, window_bounds = array<i64: 2, 400>}, {transform_indices = @transform_1, window_bounds = array<i64: 2, 400>}, {transform_indices = @transform_2, window_bounds = array<i64: 1, 2, 400>}]} {
    %c0_i32 = arith.constant 0 : i32
    %0 = arith.cmpi eq, %arg1, %c0_i32 : i32
    %1 = arith.extui %0 : i1 to i32
    %c0_i32_0 = arith.constant 0 : i32
    %2 = arith.cmpi ne, %1, %c0_i32_0 : i32
    scf.if %2 {
      %cst_20 = arith.constant 0.000000e+00 : f32
      %45 = vector.broadcast %cst_20 : f32 to vector<1x2x400xf32>
      %c0_21 = arith.constant 0 : index
      %c0_22 = arith.constant 0 : index
      %c0_23 = arith.constant 0 : index
      %46 = vector.load %arg5[%c0_21, %c0_22, %c0_23] : memref<1x2x400xf32, #tpu.memory_space<vmem>>, vector<1x2x400xf32>
      tpu.vector_store %arg5[%c0_21, %c0_22, %c0_23], %45 {strides = array<i32>} : memref<1x2x400xf32, #tpu.memory_space<vmem>>, vector<1x2x400xf32>,
    } else {
    }
    %c1_i32 = arith.constant 1 : i32
    %3 = arith.muli %arg0, %c1_i32 : i32
    %4 = arith.addi %3, %arg1 : i32
    %c2_i32 = arith.constant 2 : i32
    %5 = arith.muli %4, %c2_i32 : i32
    %6 = tpu.iota {dimensions = array<i32: 0>} : vector<2x1xi32>
    %7 = vector.broadcast %5 : i32 to vector<2x1xi32>
    %8 = arith.addi %6, %7 : vector<2x1xi32>
    %c0 = arith.constant 0 : index
    %9 = memref.load %arg2[%c0] : memref<1xi32, #tpu.memory_space<smem>>
    %10 = vector.broadcast %9 : i32 to vector<2x1xi32>
    %11 = arith.cmpi slt, %8, %10 : vector<2x1xi32>
    %c0_1 = arith.constant 0 : index
    %c0_2 = arith.constant 0 : index
    %12 = vector.load %arg3[%c0_1, %c0_2] : memref<2x400xf32, #tpu.memory_space<vmem>>, vector<2x400xf32>
    %13 = arith.negf %12 : vector<2x400xf32>
    %14 = math.exp %13 : vector<2x400xf32>
    %cst = arith.constant 1.000000e+00 : f32
    %15 = vector.broadcast %cst : f32 to vector<2x400xf32>
    %16 = arith.addf %15, %14 : vector<2x400xf32>
    %17 = arith.divf %15, %16 : vector<2x400xf32>
    %cst_3 = arith.constant 0.000000e+00 : f32
    %18 = vector.shape_cast %11 : vector<2x1xi1> to vector<2x1xi1>
    %19 = vector.broadcast %18 : vector<2x1xi1> to vector<2x400xi1>
    %20 = vector.broadcast %cst_3 : f32 to vector<2x400xf32>
    %21 = arith.select %19, %17, %20 : vector<2x400xi1>, vector<2x400xf32>
    %c0_4 = arith.constant 0 : index
    %c0_5 = arith.constant 0 : index
    %22 = vector.load %arg4[%c0_4, %c0_5] : memref<2x400xf32, #tpu.memory_space<vmem>>, vector<2x400xf32>
    %cst_6 = arith.constant 0.000000e+00 : f32
    %23 = vector.shape_cast %11 : vector<2x1xi1> to vector<2x1xi1>
    %24 = vector.broadcast %23 : vector<2x1xi1> to vector<2x400xi1>
    %25 = vector.broadcast %cst_6 : f32 to vector<2x400xf32>
    %26 = arith.select %24, %22, %25 : vector<2x400xi1>, vector<2x400xf32>
    %27 = arith.mulf %21, %26 : vector<2x400xf32>
    %28 = arith.addf %21, %26 : vector<2x400xf32>
    %cst_7 = arith.constant dense<0.000000e+00> : vector<400xf32>
    %29 = vector.multi_reduction <add>, %27, %cst_7 [0] : vector<2x400xf32> to vector<400xf32>
    %30 = vector.shape_cast %29 : vector<400xf32> to vector<1x400xf32>
    %cst_8 = arith.constant dense<0.000000e+00> : vector<400xf32>
    %31 = vector.multi_reduction <add>, %28, %cst_8 [0] : vector<2x400xf32> to vector<400xf32>
    %32 = vector.shape_cast %31 : vector<400xf32> to vector<1x400xf32>
    %c0_9 = arith.constant 0 : index
    %c0_10 = arith.constant 0 : index
    %c0_11 = arith.constant 0 : index
    %33 = vector.load %arg5[%c0_9, %c0_10, %c0_11] : memref<1x2x400xf32, #tpu.memory_space<vmem>>, vector<1x1x400xf32>
    %34 = vector.shape_cast %33 : vector<1x1x400xf32> to vector<1x400xf32>
    %35 = arith.addf %34, %30 : vector<1x400xf32>
    %c0_12 = arith.constant 0 : index
    %c0_13 = arith.constant 0 : index
    %c0_14 = arith.constant 0 : index
    %36 = vector.load %arg5[%c0_12, %c0_13, %c0_14] : memref<1x2x400xf32, #tpu.memory_space<vmem>>, vector<1x1x400xf32>
    %37 = vector.shape_cast %36 : vector<1x1x400xf32> to vector<1x400xf32>
    %38 = vector.shape_cast %35 : vector<1x400xf32> to vector<1x1x400xf32>
    tpu.vector_store %arg5[%c0_12, %c0_13, %c0_14], %38 {strides = array<i32>} : memref<1x2x400xf32, #tpu.memory_space<vmem>>, vector<1x1x400xf32>,
    %c0_15 = arith.constant 0 : index
    %c1 = arith.constant 1 : index
    %c0_16 = arith.constant 0 : index
    %39 = vector.load %arg5[%c0_15, %c1, %c0_16] : memref<1x2x400xf32, #tpu.memory_space<vmem>>, vector<1x1x400xf32>
    %40 = vector.shape_cast %39 : vector<1x1x400xf32> to vector<1x400xf32>
    %41 = arith.addf %40, %32 : vector<1x400xf32>
    %c0_17 = arith.constant 0 : index
    %c1_18 = arith.constant 1 : index
    %c0_19 = arith.constant 0 : index
    %42 = vector.load %arg5[%c0_17, %c1_18, %c0_19] : memref<1x2x400xf32, #tpu.memory_space<vmem>>, vector<1x1x400xf32>
    %43 = vector.shape_cast %42 : vector<1x1x400xf32> to vector<1x400xf32>
    %44 = vector.shape_cast %41 : vector<1x400xf32> to vector<1x1x400xf32>
    tpu.vector_store %arg5[%c0_17, %c1_18, %c0_19], %44 {strides = array<i32>} : memref<1x2x400xf32, #tpu.memory_space<vmem>>, vector<1x1x400xf32>,
    return
  }
  func.func @transform_0(%arg0: i32, %arg1: i32, %arg2: memref<1xi32, #tpu.memory_space<smem>>) -> (i32, i32) {
    %c1_i32 = arith.constant 1 : i32
    %0 = arith.muli %arg0, %c1_i32 : i32
    %1 = arith.addi %0, %arg1 : i32
    %c0_i32 = arith.constant 0 : i32
    %c0_i32_0 = arith.constant 0 : i32
    return %1, %c0_i32 : i32, i32
  }
  func.func @transform_1(%arg0: i32, %arg1: i32, %arg2: memref<1xi32, #tpu.memory_space<smem>>) -> (i32, i32) {
    %c1_i32 = arith.constant 1 : i32
    %0 = arith.muli %arg0, %c1_i32 : i32
    %1 = arith.addi %0, %arg1 : i32
    %c0_i32 = arith.constant 0 : i32
    %c0_i32_0 = arith.constant 0 : i32
    return %1, %c0_i32 : i32, i32
  }
  func.func @transform_2(%arg0: i32, %arg1: i32, %arg2: memref<1xi32, #tpu.memory_space<smem>>) -> (i32, i32, i32) {
    %c0_i32 = arith.constant 0 : i32
    %c0_i32_0 = arith.constant 0 : i32
    %c0_i32_1 = arith.constant 0 : i32
    return %arg0, %c0_i32, %c0_i32_0 : i32, i32, i32
  }
}

</mosaic_0001>

<bundles_post_ra>
// kernel: dice_loss.1
= control target key start
LH: loop header
LB: loop body
LE: loop exit
PB: predicated region body
PF: predicated region fallthrough
CT: control target
= control target key end

     0   :  { %vm57_vm0 = vcmask 1041408   ;;  %vm58_vm1 = vcmask 1043458   ;;  %vm60_vm2 = vcmask 1045508   ;;  %vm62_vm3 = vcmask 130054   ;;  %s384_s1 = inlined_call_operand.vmem [shape: f32[2,400], index: 1, kind: input, shape index: {}]   ;;  %s385_s3 = inlined_call_operand.vmem [shape: f32[1,2,400], index: 3, kind: output, shape index: {}]   ;;  %s386_s2 = inlined_call_operand.vmem [shape: f32[2,400], index: 2, kind: input, shape index: {}]   ;;  %s387_s0 = inlined_call_operand.<no memory space> [shape: s32[1], index: 0, kind: input, shape index: {}]  }
   0x1   :  { %vm59_vm4 = vmor %vm58_vm1, %vm57_vm0  ;;  %v74_v0 = vld [vmem:[%s384_s1] sm:$0xff]  ;;  %v298_v2 = vmov 0.0   ;;  %v67_v3 = vlaneseq  ;;  %v299_v4 = vmov 1983009808   ;;  %v72_v13 = vstv %s387_s0 }
   0x2   :  { %vm61_vm5 = vmor %vm60_vm2, %vm59_vm4  ;;  %v287_v1 = vmul.f32 -1.442695, %v74_v0  ;;  %v86_v5 = vunpack.c.l.s4 %v299_v4  ;;  %v109_v10 = vld [vmem:[%s386_s2] sm:$0xff]  ;;  %v300_v19 = vmov 1966171168   ;;  %vm166_vm8 = vcmask 123904  }
   0x3   :  { %vm63_vm6 = vmor %vm62_vm3, %vm61_vm5  ;;  %v329_v8 = vshrl.u32 %v67_v3, 7  ;;  %v111_v12 = vcombine.high %v109_v10, %v109_v10  ;;  %v343_v20 = vunpack.c.l.s4 %v300_v19  ;;  %vm235_vm9 = vcmp.lt.s32.totalorder %v67_v3, 400 }
   0x4   :  { %64 = vst.msk [vmem:[%s385_s3] sm:$0xff] %vm63_vm6, %v298_v2  ;;  %294 = vpow2.f32 %v287_v1  ;;  %v87_v9 = vunpack.c.0.s8 %v86_v5 }
   0x5   :  { %vm339_vm7 = vcmp.lt.s32.totalorder %v329_v8, %v72_v13  ;;  %v211_v31 = vunpack.c.0.s8 %v343_v20 }
   0x6   :  { %v90_v11 = vsub.s32 %v87_v9, %v329_v8 }
   0x8   :  { %v118_v14 = vrot.slane %v109_v10, %v90_v11  ;;  %v125_v15 = vrot.slane %v111_v12, %v90_v11 }
   0xa   :  { %v126_v17 = vcombine.high %v118_v14, %v118_v14  ;;  %v127_v23 = vcombine.high %v125_v15, %v125_v15  ;;  %v132_v24 = vsel %vm339_vm7, %v118_v14, 0.0  ;;  %v134_v25 = vsel %vm339_vm7, %v125_v15, 0.0 }
   0xc   :  { %v133_v29 = vsel %vm339_vm7, %v126_v17, 0.0  ;;  %v135_v36 = vsel %vm339_vm7, %v127_v23, 0.0 }
  0x11   :  { %v295_v6 = vpop.eup %294 }
  0x12   :  { %v78_v7 = vadd.f32 1.0, %v295_v6 }
  0x14   :  { %296 = vrcp.f32 %v78_v7 }
  0x21   :  { %v297_v18 = vpop.eup %296 }
  0x22   :  { %v84_v21 = vcombine.high %v297_v18, %v297_v18  ;;  %v91_v22 = vrot.slane %v297_v18, %v90_v11 }
  0x24   :  { %v98_v26 = vrot.slane %v84_v21, %v90_v11  ;;  %v99_v27 = vcombine.high %v91_v22, %v91_v22  ;;  %v105_v28 = vsel %vm339_vm7, %v91_v22, 0.0 }
  0x25   :  { %v136_v30 = vmul.f32 %v132_v24, %v105_v28  ;;  %v140_v32 = vadd.f32 %v132_v24, %v105_v28 }
  0x26   :  { %v100_v33 = vcombine.high %v98_v26, %v98_v26  ;;  %v106_v34 = vsel %vm339_vm7, %v99_v27, 0.0  ;;  %v107_v35 = vsel %vm339_vm7, %v98_v26, 0.0 }
  0x27   :  { %v137_v37 = vmul.f32 %v133_v29, %v106_v34  ;;  %v138_v38 = vmul.f32 %v134_v25, %v107_v35  ;;  %v145_v39 = vsel %vm57_vm0, %v136_v30, 0.0  ;;  %v141_v40 = vadd.f32 %v133_v29, %v106_v34 }
  0x28   :  { %v108_v41 = vsel %vm339_vm7, %v100_v33, 0.0  ;;  %v146_v42 = vrot.slane %v145_v39, 4  ;;  %v142_v43 = vadd.f32 %v134_v25, %v107_v35  ;;  %v174_v44 = vsel %vm57_vm0, %v140_v32, 0.0 }
  0x29   :  { %v139_v45 = vmul.f32 %v135_v36, %v108_v41  ;;  %v152_v46 = vsel %vm57_vm0, %v137_v37, 0.0  ;;  %v159_v47 = vsel %vm57_vm0, %v138_v38, 0.0  ;;  %v143_v48 = vadd.f32 %v135_v36, %v108_v41 }
  0x2a   :  { %v147_v49 = vadd.f32 %v146_v42, %v145_v39  ;;  %v153_v50 = vrot.slane %v152_v46, 4  ;;  %v160_v51 = vrot.slane %v159_v47, 4  ;;  %v175_v52 = vrot.slane %v174_v44, 4 }
  0x2b   :  { %v167_v53 = vsel %vm166_vm8, %v139_v45, 0.0  ;;  %v181_v54 = vsel %vm57_vm0, %v141_v40, 0.0  ;;  %v188_v55 = vsel %vm57_vm0, %v142_v43, 0.0  ;;  %v195_v56 = vsel %vm166_vm8, %v143_v48, 0.0 }
  0x2c   :  { %v148_v57 = vrot.slane %v147_v49, 2  ;;  %v154_v58 = vadd.f32 %v153_v50, %v152_v46  ;;  %v161_v59 = vadd.f32 %v160_v51, %v159_v47  ;;  %v168_v60 = vrot.slane %v167_v53, 4  ;;  %v288_v50 = vld [vmem:[%s385_s3 + $0x1] ss:$2 sm:$0xf] }
  0x2d   :  { %v176_v61 = vadd.f32 %v175_v52, %v174_v44  ;;  %v182_v62 = vrot.slane %v181_v54, 4  ;;  %v189_v63 = vrot.slane %v188_v55, 4  ;;  %v196_v0 = vrot.slane %v195_v56, 4 }
  0x2e   :  { %v149_v1 = vadd.f32 %v148_v57, %v147_v49  ;;  %v155_v2 = vrot.slane %v154_v58, 2  ;;  %v162_v4 = vrot.slane %v161_v59, 2  ;;  %v169_v5 = vadd.f32 %v168_v60, %v167_v53 }
  0x2f   :  { %v177_v6 = vrot.slane %v176_v61, 2  ;;  %v183_v7 = vadd.f32 %v182_v62, %v181_v54  ;;  %v190_v9 = vadd.f32 %v189_v63, %v188_v55  ;;  %v197_v10 = vadd.f32 %v196_v0, %v195_v56 }
  0x30   :  { %v150_v11 = vrot.slane %v149_v1, 1  ;;  %v156_v12 = vadd.f32 %v155_v2, %v154_v58  ;;  %v163_v13 = vadd.f32 %v162_v4, %v161_v59  ;;  %v170_v14 = vrot.slane %v169_v5, 2 }
  0x31   :  { %v178_v15 = vadd.f32 %v177_v6, %v176_v61  ;;  %v184_v16 = vrot.slane %v183_v7, 2  ;;  %v191_v17 = vrot.slane %v190_v9, 2  ;;  %v198_v18 = vrot.slane %v197_v10, 2 }
  0x32   :  { %v151_v19 = vadd.f32 %v150_v11, %v149_v1  ;;  %v157_v20 = vrot.slane %v156_v12, 1  ;;  %v164_v21 = vrot.slane %v163_v13, 1  ;;  %v171_v22 = vadd.f32 %v170_v14, %v169_v5 }
  0x33   :  { %v179_v23 = vrot.slane %v178_v15, 1  ;;  %v185_v24 = vadd.f32 %v184_v16, %v183_v7  ;;  %v192_v25 = vadd.f32 %v191_v17, %v190_v9  ;;  %v199_v26 = vadd.f32 %v198_v18, %v197_v10 }
  0x34   :  { %v158_v27 = vadd.f32 %v157_v20, %v156_v12  ;;  %v165_v28 = vadd.f32 %v164_v21, %v163_v13  ;;  %v172_v29 = vrot.slane %v171_v22, 1  ;;  %v214_v30 = vsub.s32 %v211_v31, %v329_v8  ;;  %v202_v8 = vld [vmem:[%s385_s3] ss:$2 sm:$0xf] }
  0x35   :  { %v180_v32 = vadd.f32 %v179_v23, %v178_v15  ;;  %v186_v33 = vrot.slane %v185_v24, 1  ;;  %v193_v34 = vrot.slane %v192_v25, 1  ;;  %v200_v35 = vrot.slane %v199_v26, 1 }
  0x36   :  { %v173_v36 = vadd.f32 %v172_v29, %v171_v22  ;;  %v207_v37 = vcombine.low %v151_v19, %v158_v27 }
  0x37   :  { %v187_v38 = vadd.f32 %v186_v33, %v185_v24  ;;  %v194_v39 = vadd.f32 %v193_v34, %v192_v25  ;;  %v201_v40 = vadd.f32 %v200_v35, %v199_v26 }
  0x38   :  { %v208_v41 = vcombine.low %v165_v28, %v173_v36  ;;  %v215_v42 = vrot.slane %v207_v37, %v214_v30 }
  0x39   :  { %v244_v43 = vcombine.low %v180_v32, %v187_v38  ;;  %v245_v44 = vcombine.low %v194_v39, %v201_v40 }
  0x3a   :  { %v222_v45 = vrot.slane %v208_v41, %v214_v30 }
  0x3b   :  { %v252_v46 = vrot.slane %v244_v43, %v214_v30  ;;  %v259_v47 = vrot.slane %v245_v44, %v214_v30 }
  0x3c   :  { %v223_v48 = vcombine.low %v215_v42, %v222_v45 }
  0x3d   :  { %v260_v31 = vcombine.low %v252_v46, %v259_v47 }
  0x3e   :  { %v230_v49 = vrot.slane %v223_v48, %v214_v30 }
  0x3f   :  { %v267_v51 = vrot.slane %v260_v31, %v214_v30 }
  0x40   :  { %v232_v52 = vadd.f32 %v230_v49, %v202_v8 }
  0x41   :  { %v269_v53 = vadd.f32 %v288_v50, %v267_v51 }
  0x42   :  { %237 = vst.msk [vmem:[%s385_s3] ss:$2 sm:$0xf] %vm235_vm9, %v232_v52 }
  0x43   :  { %289 = vst.msk [vmem:[%s385_s3 + $0x1] ss:$2 sm:$0xf] %vm235_vm9, %v269_v53 }

</bundles_post_ra>
